<compile_context>
chip_gen: v7x
topology: tpu7x:2x2x1
jax: 0.10.0
libtpu: 0.0.40
codegen_flags: <defaults>
</compile_context>

<pallas_src>
import math

import jax
import jax.numpy as jnp
from jax import lax
from jax.experimental import pallas as pl
from jax.experimental.pallas import tpu as pltpu


def _round_up(n, m):
    return ((n + m - 1) // m) * m


def _pick_time_block(T, max_ts=16):
    """Largest divisor of T that is <= max_ts (steps fused per grid iteration)."""
    for ts in range(min(T, max_ts), 0, -1):
        if T % ts == 0:
            return ts
    return 1


def _sigmoid(x):
    # exp -> EUP; approx reciprocal -> EUP vrcp slot (not a VALU divide). [F6]
    return pl.reciprocal(1.0 + jnp.exp(-x), approx=True)


def _gates(store, c_prev, hp):
    """store: (B, 4*hp) f32 pre-activations, lane-aligned gate order [i,f,g,o]."""
    i = _sigmoid(store[:, 0 * hp:1 * hp])
    f = _sigmoid(store[:, 1 * hp:2 * hp])
    g = jnp.tanh(store[:, 2 * hp:3 * hp])
    o = _sigmoid(store[:, 3 * hp:4 * hp])
    c_new = f * c_prev + i * g
    h_new = o * jnp.tanh(c_new)
    return c_new, h_new


# ----------------------------------------------------------------------------
# Single-step kernel (matches module.forward exactly: returns (c', h'))
# ----------------------------------------------------------------------------
def _lstm_cell_kernel(x_ref, h_ref, c_ref, w_ref, b_ref,
                      c_out_ref, h_out_ref, xh_ref):
    ip = x_ref.shape[1]
    hp = h_ref.shape[1]
    # Pack [x | h] into one bf16 operand -> a single MXU contraction over I+H.
    xh_ref[:, :ip] = x_ref[...].astype(xh_ref.dtype)
    xh_ref[:, ip:] = h_ref[...].astype(xh_ref.dtype)
    store = jnp.dot(xh_ref[...], w_ref[...], preferred_element_type=jnp.float32)
    store = store + b_ref[...]                      # f32 bias, broadcast over batch
    c_new, h_new = _gates(store, c_ref[...].astype(jnp.float32), hp)
    c_out_ref[...] = c_new.astype(c_out_ref.dtype)
    h_out_ref[...] = h_new.astype(h_out_ref.dtype)


# ----------------------------------------------------------------------------
# Fused-sequence kernel: TS time steps per grid iteration, T//TS iterations.
# Weights stay VMEM-resident; c carry and bf16 h operand persist in scratch.
# ----------------------------------------------------------------------------
def _lstm_seq_kernel(x_ref, h0_ref, c0_ref, w_ref, b_ref,
                     hseq_ref, cfin_ref,
                     c_sc, xh_ref):
    ts, _, ip = x_ref.shape
    hp = h0_ref.shape[1]
    blk = pl.program_id(0)

    @pl.when(blk == 0)
    def _():
        c_sc[...] = c0_ref[...].astype(c_sc.dtype)
        xh_ref[:, ip:] = h0_ref[...].astype(xh_ref.dtype)     # [F3] h lives in xh

    def step(s, c_prev):
        xh_ref[:, :ip] = x_ref[s]                             # bf16 x, no cast [F5]
        store = jnp.dot(xh_ref[...], w_ref[...],
                        preferred_element_type=jnp.float32)
        store = store + b_ref[...]
        c_new, h_new = _gates(store, c_prev, hp)
        hseq_ref[s] = h_new.astype(hseq_ref.dtype)            # bf16 writeback [F5]
        xh_ref[:, ip:] = h_new.astype(xh_ref.dtype)           # next step's h [F3]
        return c_new

    c_last = lax.fori_loop(0, ts, step, c_sc[...], unroll=True)   # [F1]
    c_sc[...] = c_last

    @pl.when(blk == pl.num_programs(0) - 1)                    # [F2]
    def _():
        cfin_ref[...] = c_last.astype(cfin_ref.dtype)


# ----------------------------------------------------------------------------
# Parameter preparation (done ONCE, hoisted out of the per-call path)
# ----------------------------------------------------------------------------
def init_params(key, input_size, hidden_size, dtype=jnp.float32):
    """PyTorch nn.Linear(I+H, 4H) default init: U[-1/sqrt(fan_in), 1/sqrt(fan_in)]."""
    k1, k2 = jax.random.split(key)
    fan_in = input_size + hidden_size
    bound = 1.0 / math.sqrt(fan_in)
    W = jax.random.uniform(k1, (4 * hidden_size, fan_in), dtype, -bound, bound)
    b = jax.random.uniform(k2, (4 * hidden_size,), dtype, -bound, bound)
    return W, b


def prepare_params(W, b, input_size, hidden_size, compute_dtype=jnp.bfloat16):
    """Convert PyTorch-layout params (W:(4H,I+H), b:(4H,)) to kernel layout.

    Weights pre-transposed to (Ip+Hp, 4*Hp), zero-padded so each gate block is
    lane-aligned (Hp multiple of 128), cast to `compute_dtype`. Bias (1, 4*Hp) f32.
    Zero-padded weight rows + zero bias lanes keep padded hidden lanes / batch
    rows at exactly 0 through the recurrence.
    """
    I, H = input_size, hidden_size
    Ip, Hp = _round_up(I, 128), _round_up(H, 128)
    Wg = W.reshape(4, H, I + H)                              # gate-major
    Wx = jnp.transpose(Wg[:, :, :I], (2, 0, 1))              # (I, 4, H)
    Wh = jnp.transpose(Wg[:, :, I:], (2, 0, 1))              # (H, 4, H)
    Wx = jnp.pad(Wx, ((0, Ip - I), (0, 0), (0, Hp - H)))     # (Ip, 4, Hp)
    Wh = jnp.pad(Wh, ((0, Hp - H), (0, 0), (0, Hp - H)))     # (Hp, 4, Hp)
    w_k = jnp.concatenate([Wx, Wh], axis=0).reshape(Ip + Hp, 4 * Hp)
    b_k = jnp.pad(b.reshape(4, H), ((0, 0), (0, Hp - H))).reshape(1, 4 * Hp)
    return {
        "w": w_k.astype(compute_dtype),
        "b": b_k.astype(jnp.float32),
        "input_size": I,
        "hidden_size": H,
        "Ip": Ip,
        "Hp": Hp,
    }


# ----------------------------------------------------------------------------
# Wrappers
# ----------------------------------------------------------------------------
def lstm_cell(x, hc, params):
    """Single LSTM time step. Matches the PyTorch module: returns (c', h').

    Note: for any multi-step loop prefer lstm_sequence (keeps W resident,
    avoids per-call launch overhead and pad/slice churn).
    """
    h, c = hc
    B = x.shape[0]
    I, H = params["input_size"], params["hidden_size"]
    Ip, Hp = params["Ip"], params["Hp"]
    Bp = _round_up(B, 16)                                     # bf16 sublanes [F4]
    dt = x.dtype

    x_p = jnp.pad(x, ((0, Bp - B), (0, Ip - I)))
    h_p = jnp.pad(h, ((0, Bp - B), (0, Hp - H)))
    c_p = jnp.pad(c, ((0, Bp - B), (0, Hp - H)))

    vmem = pl.BlockSpec(memory_space=pltpu.MemorySpace.VMEM)
    c_new, h_new = pl.pallas_call(
        _lstm_cell_kernel,
        out_shape=(jax.ShapeDtypeStruct((Bp, Hp), dt),
                   jax.ShapeDtypeStruct((Bp, Hp), dt)),
        in_specs=[vmem, vmem, vmem, vmem, vmem],
        out_specs=(vmem, vmem),
        scratch_shapes=[pltpu.VMEM((Bp, Ip + Hp), params["w"].dtype)],
    )(x_p, h_p, c_p, params["w"], params["b"])
    return c_new[:B, :H], h_new[:B, :H]


def lstm_sequence(xs, hc0, params):
    """Run T LSTM steps in one pallas_call (per-step math identical to lstm_cell).

    xs: (T, B, I). Returns (h_seq (T,B,H) in bf16, (c_T f32, h_T bf16)).
    """
    T, B, _ = xs.shape
    h0, c0 = hc0
    I, H = params["input_size"], params["hidden_size"]
    Ip, Hp = params["Ip"], params["Hp"]
    Bp = _round_up(B, 16)                                     # [F4]
    TS = _pick_time_block(T)                                  # [F1]
    n_blk = T // TS
    cdt = params["w"].dtype                                   # bf16 stream dtype

    xs_p = jnp.pad(xs, ((0, 0), (0, Bp - B), (0, Ip - I))).astype(cdt)   # [F5]
    h0_p = jnp.pad(h0, ((0, Bp - B), (0, Hp - H)))
    c0_p = jnp.pad(c0, ((0, Bp - B), (0, Hp - H)))

    # VMEM footprint estimate: resident W/b/h0/c0/cfin + double-buffered streamed
    # x / hseq blocks + carry & pack scratch; clamp to [16 MiB, 64 MiB]. [F7]
    blk_bytes = TS * Bp * (Ip + Hp) * 2
    need = (params["w"].size * 2 + params["b"].size * 4
            + 4 * blk_bytes + 4 * Bp * Hp * 4
            + Bp * (Ip + Hp) * 2 + Bp * 4 * Hp * 4)
    vmem_limit = int(min(64 * 2**20, max(16 * 2**20, 2 * need)))

    h_seq, c_fin = pl.pallas_call(
        _lstm_seq_kernel,
        out_shape=(jax.ShapeDtypeStruct((T, Bp, Hp), cdt),    # per-step h (bf16)
                   jax.ShapeDtypeStruct((Bp, Hp), jnp.float32)),  # final cell
        grid=(n_blk,),
        in_specs=[
            pl.BlockSpec((TS, Bp, Ip), lambda t: (t, 0, 0)),  # TS x-steps / iter
            pl.BlockSpec((Bp, Hp), lambda t: (0, 0)),         # h0 (resident)
            pl.BlockSpec((Bp, Hp), lambda t: (0, 0)),         # c0 (resident)
            pl.BlockSpec((Ip + Hp, 4 * Hp), lambda t: (0, 0)),  # W (resident)
            pl.BlockSpec((1, 4 * Hp), lambda t: (0, 0)),      # b (resident)
        ],
        out_specs=(
            pl.BlockSpec((TS, Bp, Hp), lambda t: (t, 0, 0)),  # per-step h block
            pl.BlockSpec((Bp, Hp), lambda t: (0, 0)),         # final c (resident)
        ),
        scratch_shapes=[
            pltpu.VMEM((Bp, Hp), jnp.float32),                # c carry (f32)
            pltpu.VMEM((Bp, Ip + Hp), cdt),                   # packed [x|h] operand
        ],
        compiler_params=pltpu.CompilerParams(
            dimension_semantics=("arbitrary",),               # time is sequential
            vmem_limit_bytes=vmem_limit),
    )(xs_p, h0_p, c0_p, params["w"], params["b"])

    h_seq = h_seq[:, :B, :H]
    return h_seq, (c_fin[:B, :H], h_seq[-1])


# ----------------------------------------------------------------------------
# Pure-JAX reference (mirrors the PyTorch module exactly)
# ----------------------------------------------------------------------------
def lstm_cell_ref(x, hc, W, b, H):
    h, c = hc
    store = jnp.concatenate([x, h], axis=-1) @ W.T + b
    i = jax.nn.sigmoid(store[:, :H])
    f = jax.nn.sigmoid(store[:, H:2 * H])
    g = jnp.tanh(store[:, 2 * H:3 * H])
    o = jax.nn.sigmoid(store[:, 3 * H:])
    c_new = f * c + i * g
    h_new = o * jnp.tanh(c_new)
    return c_new, h_new


if __name__ == "__main__":
    key = jax.random.PRNGKey(0)
    kx, kh, kc, kp, ks = jax.random.split(key, 5)

    batch, input_size, hidden_size, seq_len = 2, 16, 32, 8

    x = jax.random.normal(kx, (batch, input_size), jnp.float32)
    h0 = jax.random.normal(kh, (batch, hidden_size), jnp.float32)
    c0 = jax.random.normal(kc, (batch, hidden_size), jnp.float32)
    xs = jax.random.normal(ks, (seq_len, batch, input_size), jnp.float32)

    W, b = init_params(kp, input_size, hidden_size)
    params = prepare_params(W, b, input_size, hidden_size)   # one-time layout/bf16 prep

    # --- single step: module.forward semantics, returns (c', h') -----------
    c1, h1 = jax.block_until_ready(lstm_cell(x, (h0, c0), params))
    c1_ref, h1_ref = lstm_cell_ref(x, (h0, c0), W, b, hidden_size)
    assert c1.shape == (batch, hidden_size) and h1.shape == (batch, hidden_size)
    assert jnp.allclose(c1, c1_ref, atol=2e-2, rtol=2e-2)    # bf16 matmul operands
    assert jnp.allclose(h1, h1_ref, atol=2e-2, rtol=2e-2)

    # --- fused sequence: T steps, TS-blocked grid, one pallas_call ----------
    h_seq, (c_T, h_T) = jax.block_until_ready(lstm_sequence(xs, (h0, c0), params))
    h_r, c_r = h0, c0
    hs_ref = []
    for t in range(seq_len):
        c_r, h_r = lstm_cell_ref(xs[t], (h_r, c_r), W, b, hidden_size)
        hs_ref.append(h_r)
    hs_ref = jnp.stack(hs_ref)
    assert h_seq.shape == (seq_len, batch, hidden_size)
    assert jnp.allclose(h_seq.astype(jnp.float32), hs_ref, atol=4e-2, rtol=4e-2)
    assert jnp.allclose(c_T, c_r, atol=4e-2, rtol=4e-2)
    assert jnp.allclose(h_T.astype(jnp.float32), h_r, atol=4e-2, rtol=4e-2)

    print("KERNEL_OK")
</pallas_src>

<mosaic_0001>
module attributes {stable_mosaic.version = 11 : i64} {
  func.func @_lstm_cell_kernel(%arg0: memref<16x128xf32, #tpu.memory_space<vmem>>, %arg1: memref<16x128xf32, #tpu.memory_space<vmem>>, %arg2: memref<16x128xf32, #tpu.memory_space<vmem>>, %arg3: memref<256x512xbf16, #tpu.memory_space<vmem>>, %arg4: memref<1x512xf32, #tpu.memory_space<vmem>>, %arg5: memref<16x128xf32, #tpu.memory_space<vmem>>, %arg6: memref<16x128xf32, #tpu.memory_space<vmem>>, %arg7: memref<16x256xbf16, #tpu.memory_space<vmem>>) attributes {dimension_semantics = [], scalar_prefetch = 0 : i64, scratch_operands = 1 : i64, tpu.core_type = #tpu.core_type<tc>} {
    %c0 = arith.constant 0 : index
    %c0_0 = arith.constant 0 : index
    %0 = vector.load %arg0[%c0, %c0_0] : memref<16x128xf32, #tpu.memory_space<vmem>>, vector<16x128xf32>
    %1 = arith.truncf %0 : vector<16x128xf32> to vector<16x128xbf16>
    %c0_1 = arith.constant 0 : index
    %c0_2 = arith.constant 0 : index
    %2 = vector.load %arg7[%c0_1, %c0_2] : memref<16x256xbf16, #tpu.memory_space<vmem>>, vector<16x128xbf16>
    tpu.vector_store %arg7[%c0_1, %c0_2], %1 {strides = array<i32>} : memref<16x256xbf16, #tpu.memory_space<vmem>>, vector<16x128xbf16>,
    %c0_3 = arith.constant 0 : index
    %c0_4 = arith.constant 0 : index
    %3 = vector.load %arg1[%c0_3, %c0_4] : memref<16x128xf32, #tpu.memory_space<vmem>>, vector<16x128xf32>
    %4 = arith.truncf %3 : vector<16x128xf32> to vector<16x128xbf16>
    %c0_5 = arith.constant 0 : index
    %c128 = arith.constant 128 : index
    %5 = vector.load %arg7[%c0_5, %c128] : memref<16x256xbf16, #tpu.memory_space<vmem>>, vector<16x128xbf16>
    tpu.vector_store %arg7[%c0_5, %c128], %4 {strides = array<i32>} : memref<16x256xbf16, #tpu.memory_space<vmem>>, vector<16x128xbf16>,
    %c0_6 = arith.constant 0 : index
    %c0_7 = arith.constant 0 : index
    %6 = vector.load %arg7[%c0_6, %c0_7] : memref<16x256xbf16, #tpu.memory_space<vmem>>, vector<16x256xbf16>
    %c0_8 = arith.constant 0 : index
    %c0_9 = arith.constant 0 : index
    %7 = vector.load %arg3[%c0_8, %c0_9] : memref<256x512xbf16, #tpu.memory_space<vmem>>, vector<256x512xbf16>
    %cst = arith.constant dense<0.000000e+00> : vector<16x512xf32>
    %8 = tpu.matmul %6, %7, %cst {dimension_numbers = #tpu.dot_dimension_numbers<[1], [0], [0], [1], [0, 0, 1, 1], [], []>} : vector<16x256xbf16>, vector<256x512xbf16>, vector<16x512xf32> -> vector<16x512xf32>
    %c0_10 = arith.constant 0 : index
    %c0_11 = arith.constant 0 : index
    %9 = vector.load %arg4[%c0_10, %c0_11] : memref<1x512xf32, #tpu.memory_space<vmem>>, vector<1x512xf32>
    %10 = vector.broadcast %9 : vector<1x512xf32> to vector<16x512xf32>
    %11 = arith.addf %8, %10 : vector<16x512xf32>
    %c0_12 = arith.constant 0 : index
    %c0_13 = arith.constant 0 : index
    %12 = vector.load %arg2[%c0_12, %c0_13] : memref<16x128xf32, #tpu.memory_space<vmem>>, vector<16x128xf32>
    %13 = vector.extract_strided_slice %11 {offsets = [0, 0], sizes = [16, 128], strides = [1, 1]} : vector<16x512xf32> to vector<16x128xf32>
    %cst_14 = arith.constant 0.000000e+00 : f32
    %14 = vector.broadcast %cst_14 : f32 to vector<16x128xf32>
    %15 = arith.subf %14, %13 : vector<16x128xf32>
    %16 = math.exp %15 : vector<16x128xf32>
    %cst_15 = arith.constant 1.000000e+00 : f32
    %17 = vector.broadcast %cst_15 : f32 to vector<16x128xf32>
    %18 = arith.addf %17, %16 : vector<16x128xf32>
    %19 = tpu.reciprocal %18 {approx = true} : vector<16x128xf32> -> vector<16x128xf32>
    %20 = vector.extract_strided_slice %11 {offsets = [0, 128], sizes = [16, 128], strides = [1, 1]} : vector<16x512xf32> to vector<16x128xf32>
    %cst_16 = arith.constant 0.000000e+00 : f32
    %21 = vector.broadcast %cst_16 : f32 to vector<16x128xf32>
    %22 = arith.subf %21, %20 : vector<16x128xf32>
    %23 = math.exp %22 : vector<16x128xf32>
    %cst_17 = arith.constant 1.000000e+00 : f32
    %24 = vector.broadcast %cst_17 : f32 to vector<16x128xf32>
    %25 = arith.addf %24, %23 : vector<16x128xf32>
    %26 = tpu.reciprocal %25 {approx = true} : vector<16x128xf32> -> vector<16x128xf32>
    %27 = vector.extract_strided_slice %11 {offsets = [0, 256], sizes = [16, 128], strides = [1, 1]} : vector<16x512xf32> to vector<16x128xf32>
    %28 = math.tanh %27 : vector<16x128xf32>
    %29 = vector.extract_strided_slice %11 {offsets = [0, 384], sizes = [16, 128], strides = [1, 1]} : vector<16x512xf32> to vector<16x128xf32>
    %cst_18 = arith.constant 0.000000e+00 : f32
    %30 = vector.broadcast %cst_18 : f32 to vector<16x128xf32>
    %31 = arith.subf %30, %29 : vector<16x128xf32>
    %32 = math.exp %31 : vector<16x128xf32>
    %cst_19 = arith.constant 1.000000e+00 : f32
    %33 = vector.broadcast %cst_19 : f32 to vector<16x128xf32>
    %34 = arith.addf %33, %32 : vector<16x128xf32>
    %35 = tpu.reciprocal %34 {approx = true} : vector<16x128xf32> -> vector<16x128xf32>
    %36 = arith.mulf %26, %12 : vector<16x128xf32>
    %37 = arith.mulf %19, %28 : vector<16x128xf32>
    %38 = arith.addf %36, %37 : vector<16x128xf32>
    %39 = math.tanh %38 : vector<16x128xf32>
    %40 = arith.mulf %35, %39 : vector<16x128xf32>
    %c0_20 = arith.constant 0 : index
    %c0_21 = arith.constant 0 : index
    %41 = vector.load %arg5[%c0_20, %c0_21] : memref<16x128xf32, #tpu.memory_space<vmem>>, vector<16x128xf32>
    tpu.vector_store %arg5[%c0_20, %c0_21], %38 {strides = array<i32>} : memref<16x128xf32, #tpu.memory_space<vmem>>, vector<16x128xf32>,
    %c0_22 = arith.constant 0 : index
    %c0_23 = arith.constant 0 : index
    %42 = vector.load %arg6[%c0_22, %c0_23] : memref<16x128xf32, #tpu.memory_space<vmem>>, vector<16x128xf32>
    tpu.vector_store %arg6[%c0_22, %c0_23], %40 {strides = array<i32>} : memref<16x128xf32, #tpu.memory_space<vmem>>, vector<16x128xf32>,
    return
  }
}

</mosaic_0001>

<bundles_post_ra>
// kernel: tpu_custom_call.1
= control target key start
LH: loop header
LB: loop body
LE: loop exit
PB: predicated region body
PF: predicated region fallthrough
CT: control target
= control target key end

     0   :  { %12 = vsyncpa [#allocation4], 0  ;;  %s1157_s0 = inlined_call_operand.hbm [shape: f32[16,128], index: 0, kind: input, shape index: {}]   ;;  %s1158_s1 = inlined_call_operand.hbm [shape: f32[16,128], index: 1, kind: input, shape index: {}]   ;;  %s1159_s2 = inlined_call_operand.hbm [shape: f32[16,128], index: 2, kind: input, shape index: {}]   ;;  %s1160_s3 = inlined_call_operand.hbm [shape: bf16[256,512], index: 3, kind: input, shape index: {}]   ;;  %s1161_s4 = inlined_call_operand.vmem [shape: f32[1,512], index: 4, kind: input, shape index: {}]   ;;  %s1162_s5 = inlined_call_operand.hbm [shape: f32[16,128], index: 5, kind: output, shape index: {0}]   ;;  %s1163_s6 = inlined_call_operand.hbm [shape: f32[16,128], index: 6, kind: output, shape index: {1}]  }
   0x1   :  { %13 = vsyncpa [#allocation7], 0 }
   0x2   :  { %14 = vsyncpa [#allocation10], 0 }
   0x3   :  { %15 = vsyncpa [#allocation5], 0 }
   0x4   :  { %16 = vsyncpa [#allocation13], 0  ;;  %s1008_s21 = smov [#allocation6]   ;;  %s1009_s23 = smov [#allocation3]  }
   0x5   :  { %s34_s22 = sshll.u32 %s1008_s21, 4  ;;  %s22_s24 = sshll.u32 %s1009_s23, 4  ;;  %s35_s22 = int_to_ptr.vmem [resolvable:$true] %s34_s22  ;;  %s1053_s24 = int_to_ptr.vmem [resolvable:$true] %s22_s24 }
   0x6   :  { %s866_s27 = scalar_lea.hbm %s1158_s1, 256 }
   0x7   :  { %p867_p0 = scmp.ne.s32.totalorder %s1158_s1, %s866_s27  ;;  %p870_p1 = scmp.lt.u32.totalorder %s866_s27, %s1158_s1 }
   0x9   :  { %p872_p2 = pnand %p870_p1, %p867_p0 }
   0xb   :  { %875 = shalt.err (!%p872_p2)
}
   0xc   :  { %s876_s8 = scalar_lea.vmem %s35_s22, 256  ;;  %p881_p4 = scmp.lt.s32.totalorder %s35_s22, %s35_s22 }
   0xd   :  { %p877_p3 = scmp.ne.s32.totalorder %s35_s22, %s876_s8  ;;  %p882_p5 = scmp.lt.s32.totalorder %s876_s8, %s876_s8 }
   0xf   :  { %p883_p6 = por %p882_p5, %p881_p4 }
  0x11   :  { %p884_p7 = pnand %p883_p6, %p877_p3 }
  0x13   :  { %887 = shalt.err (!%p884_p7)
}
  0x14   :  { %s1010_s9 = smov 128   ;;  %s1011_s10 = smov 8  }
  0x15   :  { %40 = dma.hbm_to_vmem [thread:$0]  %s1158_s1, 256, %s35_s22, [#allocation7], %s1010_s9, %s1010_s9, %s1011_s10  }
  0x16   :  { %s888_s15 = scalar_lea.hbm %s1157_s0, 256 }
  0x17   :  { %p889_p8 = scmp.ne.s32.totalorder %s1157_s0, %s888_s15  ;;  %p892_p9 = scmp.lt.u32.totalorder %s888_s15, %s1157_s0 }
  0x19   :  { %p894_p10 = pnand %p892_p9, %p889_p8 }
  0x1b   :  { %897 = shalt.err (!%p894_p10)
}
  0x1c   :  { %s898_s20 = scalar_lea.vmem %s1053_s24, 256  ;;  %p903_p12 = scmp.lt.s32.totalorder %s1053_s24, %s1053_s24 }
  0x1d   :  { %p899_p11 = scmp.ne.s32.totalorder %s1053_s24, %s898_s20  ;;  %p904_p13 = scmp.lt.s32.totalorder %s898_s20, %s898_s20 }
  0x1f   :  { %p905_p0 = por %p904_p13, %p903_p12 }
  0x21   :  { %p906_p1 = pnand %p905_p0, %p899_p11 }
  0x23   :  { %909 = shalt.err (!%p906_p1)
}
  0x24   :  { %28 = dma.hbm_to_vmem [thread:$0]  %s1157_s0, 256, %s1053_s24, [#allocation4], %s1010_s9, %s1010_s9, %s1011_s10  }
  0x25   :  { %s1012_s22 = smov [#allocation8]   ;;  %s1013_s25 = smov [#allocation9]  }
  0x26   :  { %s46_s23 = sshll.u32 %s1012_s22, 4  ;;  %s58_s26 = sshll.u32 %s1013_s25, 4  ;;  %s47_s23 = int_to_ptr.vmem [resolvable:$true] %s46_s23  ;;  %s1090_s26 = int_to_ptr.vmem [resolvable:$true] %s58_s26 }
  0x27   :  { %s910_s29 = scalar_lea.hbm %s1159_s2, 256 }
  0x28   :  { %p911_p2 = scmp.ne.s32.totalorder %s1159_s2, %s910_s29  ;;  %p914_p3 = scmp.lt.u32.totalorder %s910_s29, %s1159_s2 }
  0x2a   :  { %p916_p4 = pnand %p914_p3, %p911_p2 }
  0x2c   :  { %919 = shalt.err (!%p916_p4)
}
  0x2d   :  { %s920_s0 = scalar_lea.vmem %s47_s23, 256  ;;  %p925_p6 = scmp.lt.s32.totalorder %s47_s23, %s47_s23 }
  0x2e   :  { %p921_p5 = scmp.ne.s32.totalorder %s47_s23, %s920_s0  ;;  %p926_p7 = scmp.lt.s32.totalorder %s920_s0, %s920_s0 }
  0x30   :  { %p927_p8 = por %p926_p7, %p925_p6 }
  0x32   :  { %p928_p9 = pnand %p927_p8, %p921_p5 }
  0x34   :  { %931 = shalt.err (!%p928_p9)
}
  0x35   :  { %52 = dma.hbm_to_vmem [thread:$0]  %s1159_s2, 256, %s47_s23, [#allocation7], %s1010_s9, %s1010_s9, %s1011_s10  }
  0x36   :  { %s932_s15 = scalar_lea.hbm %s1160_s3, 8192 }
  0x37   :  { %p933_p10 = scmp.ne.s32.totalorder %s1160_s3, %s932_s15  ;;  %p936_p11 = scmp.lt.u32.totalorder %s932_s15, %s1160_s3 }
  0x39   :  { %p938_p12 = pnand %p936_p11, %p933_p10 }
  0x3b   :  { %941 = shalt.err (!%p938_p12)
}
  0x3c   :  { %s942_s20 = scalar_lea.vmem %s1090_s26, 8192  ;;  %p947_p0 = scmp.lt.s32.totalorder %s1090_s26, %s1090_s26 }
  0x3d   :  { %p943_p13 = scmp.ne.s32.totalorder %s1090_s26, %s942_s20  ;;  %p948_p1 = scmp.lt.s32.totalorder %s942_s20, %s942_s20 }
  0x3f   :  { %p949_p2 = por %p948_p1, %p947_p0 }
  0x41   :  { %p950_p3 = pnand %p949_p2, %p943_p13 }
  0x43   :  { %953 = shalt.err (!%p950_p3)
}
  0x44   :  { %s1014_s2 = smov 256   ;;  %s1015_s1 = smov 16  }
  0x45   :  { %64 = dma.hbm_to_vmem [thread:$0]  %s1160_s3, 8192, %s1090_s26, [#allocation10], %s1014_s2, %s1014_s2, %s1015_s1  }
  0x46   :  { %998 = dma.done.wait [#allocation4], 256  }
  0x47   :  { %999 = vsyncadd [#allocation4], 4294967040 }
  0x48   :  { %1000 = dma.done.wait [#allocation7], 512  }
  0x49   :  { %1001 = vsyncadd [#allocation7], 4294966784 }
  0x4a   :  { %1002 = dma.done.wait [#allocation10], 8192  }
  0x4b   :  { %1003 = vsyncadd [#allocation10], 4294959104  ;;  %v738_v0 = vld [vmem:[#allocation9 + $0x4] ss:$16 sps:$4 sm:$0xff]   ;;  %v740_v1 = vld [vmem:[#allocation9] ss:$16 sps:$4 sm:$0xff]  }
  0x4c   :  { %495 = vmatprep.subr.bf16.mxu0 %v738_v0  ;;  %v741_v2 = vld [vmem:[#allocation9 + $0x24] ss:$16 sps:$4 sm:$0xff]   ;;  %v743_v3 = vld [vmem:[#allocation9 + $0x20] ss:$16 sps:$4 sm:$0xff]   ;;  %v749_v5 = vld [vmem:[#allocation9 + $0xc] ss:$16 sps:$4 sm:$0xff]  }
  0x4d   :  { %496 = vmatpush1.bf16.msra.mxu0 %v740_v1  ;;  %v744_v4 = vld [vmem:[#allocation9 + $0x44] ss:$16 sps:$4 sm:$0xff]   ;;  %v752_v6 = vld [vmem:[#allocation9 + $0x8] ss:$16 sps:$4 sm:$0xff]   ;;  %v746_v7 = vld [vmem:[#allocation9 + $0x40] ss:$16 sps:$4 sm:$0xff]   ;;  %538 = vmatprep.subr.bf16.mxu1 %v749_v5 }
  0x4e   :  { %497 = vmatprep.subr.bf16.mxu0 %v741_v2  ;;  %v747_v8 = vld [vmem:[#allocation9 + $0x64] ss:$16 sps:$4 sm:$0xff]   ;;  %539 = vmatpush1.bf16.msra.mxu1 %v752_v6  ;;  %v755_v9 = vld [vmem:[#allocation9 + $0x2c] ss:$16 sps:$4 sm:$0xff]   ;;  %v758_v10 = vld [vmem:[#allocation9 + $0x28] ss:$16 sps:$4 sm:$0xff]   ;;  %v155_v6 = vlaneseq }
  0x4f   :  { %540 = vmatprep.subr.bf16.mxu1 %v755_v9  ;;  %v751_v11 = vld [vmem:[#allocation9 + $0x60] ss:$16 sps:$4 sm:$0xff]   ;;  %v753_v12 = vld [vmem:[#allocation9 + $0x84] ss:$16 sps:$4 sm:$0xff]   ;;  %v761_v13 = vld [vmem:[#allocation9 + $0x4c] ss:$16 sps:$4 sm:$0xff]  }
  0x50   :  { %v764_v14 = vld [vmem:[#allocation9 + $0x48] ss:$16 sps:$4 sm:$0xff]   ;;  %v767_v15 = vld [vmem:[#allocation9 + $0x6c] ss:$16 sps:$4 sm:$0xff]   ;;  %v757_v16 = vld [vmem:[#allocation9 + $0x80] ss:$16 sps:$4 sm:$0xff]  }
  0x51   :  { %498 = vmatpush1.bf16.msra.mxu0 %v743_v3  ;;  %v759_v17 = vld [vmem:[#allocation9 + $0xa4] ss:$16 sps:$4 sm:$0xff]   ;;  %v770_v18 = vld [vmem:[#allocation9 + $0x68] ss:$16 sps:$4 sm:$0xff]   ;;  %v773_v19 = vld [vmem:[#allocation9 + $0x8c] ss:$16 sps:$4 sm:$0xff]  }
  0x52   :  { %499 = vmatprep.subr.bf16.mxu0 %v744_v4  ;;  %541 = vmatpush1.bf16.msra.mxu1 %v758_v10  ;;  %v763_v20 = vld [vmem:[#allocation9 + $0xa0] ss:$16 sps:$4 sm:$0xff]   ;;  %v765_v21 = vld [vmem:[#allocation9 + $0xc4] ss:$16 sps:$4 sm:$0xff]   ;;  %v776_v22 = vld [vmem:[#allocation9 + $0x88] ss:$16 sps:$4 sm:$0xff]  }
  0x53   :  { %542 = vmatprep.subr.bf16.mxu1 %v761_v13  ;;  %v779_v23 = vld [vmem:[#allocation9 + $0xac] ss:$16 sps:$4 sm:$0xff]   ;;  %v769_v24 = vld [vmem:[#allocation9 + $0xc0] ss:$16 sps:$4 sm:$0xff]   ;;  %v771_v25 = vld [vmem:[#allocation9 + $0xe4] ss:$16 sps:$4 sm:$0xff]  }
  0x54   :  { %v782_v26 = vld [vmem:[#allocation9 + $0xa8] ss:$16 sps:$4 sm:$0xff]   ;;  %v785_v27 = vld [vmem:[#allocation9 + $0xcc] ss:$16 sps:$4 sm:$0xff]   ;;  %v775_v28 = vld [vmem:[#allocation9 + $0xe0] ss:$16 sps:$4 sm:$0xff]  }
  0x55   :  { %500 = vmatpush1.bf16.msra.mxu0 %v746_v7  ;;  %v777_v29 = vld [vmem:[#allocation9 + $0x104] ss:$16 sps:$4 sm:$0xff]   ;;  %v788_v30 = vld [vmem:[#allocation9 + $0xc8] ss:$16 sps:$4 sm:$0xff]   ;;  %v791_v31 = vld [vmem:[#allocation9 + $0xec] ss:$16 sps:$4 sm:$0xff]  }
  0x56   :  { %501 = vmatprep.subr.bf16.mxu0 %v747_v8  ;;  %543 = vmatpush1.bf16.msra.mxu1 %v764_v14  ;;  %v781_v32 = vld [vmem:[#allocation9 + $0x100] ss:$16 sps:$4 sm:$0xff]   ;;  %v783_v33 = vld [vmem:[#allocation9 + $0x124] ss:$16 sps:$4 sm:$0xff]   ;;  %v794_v34 = vld [vmem:[#allocation9 + $0xe8] ss:$16 sps:$4 sm:$0xff]  }
  0x57   :  { %544 = vmatprep.subr.bf16.mxu1 %v767_v15  ;;  %v797_v35 = vld [vmem:[#allocation9 + $0x10c] ss:$16 sps:$4 sm:$0xff]   ;;  %v787_v36 = vld [vmem:[#allocation9 + $0x120] ss:$16 sps:$4 sm:$0xff]   ;;  %v789_v37 = vld [vmem:[#allocation9 + $0x144] ss:$16 sps:$4 sm:$0xff]  }
  0x58   :  { %v800_v38 = vld [vmem:[#allocation9 + $0x108] ss:$16 sps:$4 sm:$0xff]   ;;  %v803_v39 = vld [vmem:[#allocation9 + $0x12c] ss:$16 sps:$4 sm:$0xff]   ;;  %v83_v40 = vld [vmem:[#allocation6] sm:$0xff]  ;;  %v156_v7 = vshrl.u32 %v155_v6, 7 }
  0x59   :  { %502 = vmatpush1.bf16.msra.mxu0 %v751_v11  ;;  %v793_v41 = vld [vmem:[#allocation9 + $0x140] ss:$16 sps:$4 sm:$0xff]   ;;  %v795_v42 = vld [vmem:[#allocation9 + $0x164] ss:$16 sps:$4 sm:$0xff]   ;;  %v84_v43 = vld [vmem:[#allocation6 + $0x8] sm:$0xff] }
  0x5a   :  { %503 = vmatprep.subr.bf16.mxu0 %v753_v12  ;;  %545 = vmatpush1.bf16.msra.mxu1 %v770_v18  ;;  %v806_v44 = vld [vmem:[#allocation9 + $0x128] ss:$16 sps:$4 sm:$0xff]   ;;  %v85_v45 = vpack.c.bf16 %v84_v43, %v83_v40  ;;  %v809_v46 = vld [vmem:[#allocation9 + $0x14c] ss:$16 sps:$4 sm:$0xff]   ;;  %v799_v47 = vld [vmem:[#allocation9 + $0x160] ss:$16 sps:$4 sm:$0xff]  }
  0x5b   :  { %546 = vmatprep.subr.bf16.mxu1 %v773_v19  ;;  %v801_v48 = vld [vmem:[#allocation9 + $0x184] ss:$16 sps:$4 sm:$0xff]   ;;  %v812_v49 = vld [vmem:[#allocation9 + $0x148] ss:$16 sps:$4 sm:$0xff]   ;;  %v815_v50 = vld [vmem:[#allocation9 + $0x16c] ss:$16 sps:$4 sm:$0xff]  }
  0x5c   :  { %527 = vmatprep.mubr.bf16.mxu0 %v85_v45  ;;  %570 = vmatprep.mubr.bf16.mxu1 %v85_v45  ;;  %v805_v51 = vld [vmem:[#allocation9 + $0x180] ss:$16 sps:$4 sm:$0xff]   ;;  %v807_v52 = vld [vmem:[#allocation9 + $0x1a4] ss:$16 sps:$4 sm:$0xff]   ;;  %v818_v53 = vld [vmem:[#allocation9 + $0x168] ss:$16 sps:$4 sm:$0xff]  }
  0x5d   :  { %504 = vmatpush1.bf16.msra.mxu0 %v757_v16  ;;  %v821_v54 = vld [vmem:[#allocation9 + $0x18c] ss:$16 sps:$4 sm:$0xff]   ;;  %v811_v55 = vld [vmem:[#allocation9 + $0x1a0] ss:$16 sps:$4 sm:$0xff]   ;;  %v813_v56 = vld [vmem:[#allocation9 + $0x1c4] ss:$16 sps:$4 sm:$0xff]  }
  0x5e   :  { %505 = vmatprep.subr.bf16.mxu0 %v759_v17  ;;  %547 = vmatpush1.bf16.msra.mxu1 %v776_v22  ;;  %v824_v57 = vld [vmem:[#allocation9 + $0x188] ss:$16 sps:$4 sm:$0xff]   ;;  %v825_v58 = vld [vmem:[#allocation9 + $0x1ac] ss:$16 sps:$4 sm:$0xff]   ;;  %v817_v59 = vld [vmem:[#allocation9 + $0x1c0] ss:$16 sps:$4 sm:$0xff]  }
  0x5f   :  { %548 = vmatprep.subr.bf16.mxu1 %v779_v23  ;;  %v819_v60 = vld [vmem:[#allocation9 + $0x1e4] ss:$16 sps:$4 sm:$0xff]   ;;  %v827_v61 = vld [vmem:[#allocation9 + $0x1a8] ss:$16 sps:$4 sm:$0xff]   ;;  %v828_v62 = vld [vmem:[#allocation9 + $0x1cc] ss:$16 sps:$4 sm:$0xff]  }
  0x60   :  { %v823_v63 = vld [vmem:[#allocation9 + $0x1e0] ss:$16 sps:$4 sm:$0xff]   ;;  %v80_v1 = vld [vmem:[#allocation3 + $0x8] sm:$0xff]  ;;  %v157_v8 = vsub.s32 0, %v156_v7  ;;  %v161_v10 = vsub.s32 1, %v156_v7  ;;  %v169_v13 = vsub.s32 3, %v156_v7 }
  0x61   :  { %506 = vmatpush1.bf16.msra.mxu0 %v763_v20  ;;  %v79_v0 = vld [vmem:[#allocation3] sm:$0xff]  ;;  %v830_v2 = vld [vmem:[#allocation9 + $0x1c8] ss:$16 sps:$4 sm:$0xff]   ;;  %v831_v3 = vld [vmem:[#allocation9 + $0x1ec] ss:$16 sps:$4 sm:$0xff]  }
  0x62   :  { %507 = vmatprep.subr.bf16.mxu0 %v765_v21  ;;  %549 = vmatpush1.bf16.msra.mxu1 %v782_v26  ;;  %v81_v4 = vpack.c.bf16 %v80_v1, %v79_v0  ;;  %v833_v5 = vld [vmem:[#allocation9 + $0x1e8] ss:$16 sps:$4 sm:$0xff]   ;;  %v153_v9 = vld [vmem:[%s1161_s4] sm:$0xf]  ;;  %s1016_s4 = smov [#allocation11]  }
  0x63   :  { %550 = vmatprep.subr.bf16.mxu1 %v785_v27  ;;  %v158_v11 = vrot.slane %v153_v9, %v157_v8  ;;  %v162_v12 = vrot.slane %v153_v9, %v161_v10  ;;  %v170_v22 = vrot.slane %v153_v9, %v169_v13  ;;  %s634_s25 = sshll.u32 %s1016_s4, 4  ;;  %s635_s25 = int_to_ptr.vmem [resolvable:$true] %s634_s25 }
  0x64   :  { %s954_s26 = scalar_lea.vmem %s635_s25, 256  ;;  %p959_p5 = scmp.lt.s32.totalorder %s635_s25, %s635_s25 }
  0x65   :  { %508 = vmatpush1.bf16.msra.mxu0 %v769_v24  ;;  %p955_p4 = scmp.ne.s32.totalorder %s635_s25, %s954_s26  ;;  %p960_p6 = scmp.lt.s32.totalorder %s954_s26, %s954_s26 }
  0x66   :  { %509 = vmatprep.subr.bf16.mxu0 %v771_v25  ;;  %551 = vmatpush1.bf16.msra.mxu1 %v788_v30  ;;  %v165_v25 = vsub.s32 2, %v156_v7 }
  0x67   :  { %552 = vmatprep.subr.bf16.mxu1 %v791_v31  ;;  %p961_p7 = por %p960_p6, %p959_p5 }
  0x69   :  { %510 = vmatpush1.bf16.msra.mxu0 %v775_v28  ;;  %p962_p8 = pnand %p961_p7, %p955_p4 }
  0x6a   :  { %511 = vmatprep.subr.bf16.mxu0 %v777_v29  ;;  %553 = vmatpush1.bf16.msra.mxu1 %v794_v34 }
  0x6b   :  { %554 = vmatprep.subr.bf16.mxu1 %v797_v35 }
  0x6d   :  { %512 = vmatpush1.bf16.msra.mxu0 %v781_v32 }
  0x6e   :  { %513 = vmatprep.subr.bf16.mxu0 %v783_v33  ;;  %555 = vmatpush1.bf16.msra.mxu1 %v800_v38 }
  0x6f   :  { %556 = vmatprep.subr.bf16.mxu1 %v803_v39 }
  0x71   :  { %514 = vmatpush1.bf16.msra.mxu0 %v787_v36  ;;  %v166_v36 = vrot.slane %v153_v9, %v165_v25 }
  0x72   :  { %515 = vmatprep.subr.bf16.mxu0 %v789_v37  ;;  %557 = vmatpush1.bf16.msra.mxu1 %v806_v44 }
  0x73   :  { %558 = vmatprep.subr.bf16.mxu1 %v809_v46 }
  0x75   :  { %516 = vmatpush1.bf16.msra.mxu0 %v793_v41 }
  0x76   :  { %517 = vmatprep.subr.bf16.mxu0 %v795_v42  ;;  %559 = vmatpush1.bf16.msra.mxu1 %v812_v49 }
  0x77   :  { %560 = vmatprep.subr.bf16.mxu1 %v815_v50 }
  0x79   :  { %518 = vmatpush1.bf16.msra.mxu0 %v799_v47 }
  0x7a   :  { %519 = vmatprep.subr.bf16.mxu0 %v801_v48  ;;  %561 = vmatpush1.bf16.msra.mxu1 %v818_v53 }
  0x7b   :  { %562 = vmatprep.subr.bf16.mxu1 %v821_v54 }
  0x7d   :  { %520 = vmatpush1.bf16.msra.mxu0 %v805_v51 }
  0x7e   :  { %521 = vmatprep.subr.bf16.mxu0 %v807_v52  ;;  %563 = vmatpush1.bf16.msra.mxu1 %v824_v57  ;;  %v581_v57 = vld [vmem:[#allocation8] sm:$0xff] }
  0x7f   :  { %564 = vmatprep.subr.bf16.mxu1 %v825_v58 }
  0x81   :  { %522 = vmatpush1.bf16.msra.mxu0 %v811_v55 }
  0x82   :  { %523 = vmatprep.subr.bf16.mxu0 %v813_v56  ;;  %565 = vmatpush1.bf16.msra.mxu1 %v827_v61  ;;  %v582_v61 = vld [vmem:[#allocation8 + $0x8] sm:$0xff] }
  0x83   :  { %566 = vmatprep.subr.bf16.mxu1 %v828_v62 }
  0x85   :  { %524 = vmatpush1.bf16.msra.mxu0 %v817_v59 }
  0x86   :  { %525 = vmatprep.subr.bf16.mxu0 %v819_v60  ;;  %567 = vmatpush1.bf16.msra.mxu1 %v830_v2 }
  0x87   :  { %568 = vmatprep.subr.bf16.mxu1 %v831_v3 }
  0x89   :  { %526 = vmatpush1.bf16.msra.mxu0 %v823_v63 }
  0x8a   :  { %569 = vmatpush1.bf16.msra.mxu1 %v833_v5 }
  0x8c   :  { %528 = vmatmul.mubr.bf16.vlgmr.msra.gmra.mrb[0].mxu0 %v81_v4 }
  0x8d   :  { %571 = vmatmul.mubr.bf16.vlgmr.msra.gmra.mrb[0].mxu1 %v81_v4 }
 0x15f   :  { %v529_v14 = vpop.f32.mrb[0].mxu0 }
 0x160   :  { %v530_v15 = vadd.f32 %v529_v14, %v158_v11  ;;  %v531_v16 = vpop.f32.mrb[1].mxu0  ;;  %v572_v28 = vpop.f32.mrb[0].mxu1 }
 0x161   :  { %v532_v17 = vadd.f32 %v531_v16, %v162_v12  ;;  %v533_v18 = vpop.f32.mrb[2].mxu0  ;;  %v574_v31 = vpop.f32.mrb[1].mxu1  ;;  %v573_v41 = vadd.f32 %v572_v28, %v166_v36 }
 0x162   :  { %v583_v19 = vsub.f32 0.0, %v530_v15  ;;  %v534_v20 = vadd.f32 %v533_v18, %v158_v11  ;;  %v535_v21 = vpop.f32.mrb[3].mxu0  ;;  %v575_v33 = vadd.f32 %v574_v31, %v170_v22  ;;  %v576_v34 = vpop.f32.mrb[2].mxu1 }
 0x163   :  { %v593_v23 = vsub.f32 0.0, %v532_v17  ;;  %v536_v24 = vadd.f32 %v535_v21, %v162_v12  ;;  %v578_v37 = vpop.f32.mrb[3].mxu1  ;;  %v577_v43 = vadd.f32 %v576_v34, %v166_v36 }
 0x164   :  { %v585_v26 = vmul.f32 1.442695, %v583_v19  ;;  %v584_v27 = vsub.f32 0.0, %v534_v20  ;;  %v605_v38 = vsub.f32 0.0, %v575_v33  ;;  %v579_v39 = vadd.f32 %v578_v37, %v170_v22 }
 0x165   :  { %v595_v29 = vmul.f32 1.442695, %v593_v23  ;;  %v594_v30 = vsub.f32 0.0, %v536_v24 }
 0x166   :  { %834 = vpow2.f32 %v585_v26  ;;  %v587_v32 = vmul.f32 1.442695, %v584_v27  ;;  %v606_v40 = vsub.f32 0.0, %v579_v39  ;;  %v607_v42 = vmul.f32 1.442695, %v605_v38 }
 0x167   :  { %836 = vpow2.f32 %v595_v29  ;;  %v597_v35 = vmul.f32 1.442695, %v594_v30 }
 0x168   :  { %838 = vpow2.f32 %v587_v32  ;;  %v609_v44 = vmul.f32 1.442695, %v606_v40 }
 0x169   :  { %840 = vpow2.f32 %v597_v35 }
 0x16a   :  { %842 = vtanh.f32 %v573_v41 }
 0x16b   :  { %844 = vpow2.f32 %v607_v42 }
 0x16c   :  { %846 = vtanh.f32 %v577_v43 }
 0x16d   :  { %848 = vpow2.f32 %v609_v44 }
 0x170   :  { %v835_v45 = vpop.eup %834 }
 0x171   :  { %v837_v46 = vpop.eup %836  ;;  %v589_v47 = vadd.f32 1.0, %v835_v45 }
 0x172   :  { %v839_v48 = vpop.eup %838  ;;  %v599_v49 = vadd.f32 1.0, %v837_v46 }
 0x173   :  { %v841_v50 = vpop.eup %840  ;;  %850 = vrcp.f32 %v589_v47  ;;  %v590_v51 = vadd.f32 1.0, %v839_v48 }
 0x174   :  { %852 = vrcp.f32 %v599_v49  ;;  %v600_v52 = vadd.f32 1.0, %v841_v50  ;;  %v843_v53 = vpop.eup %842 }
 0x175   :  { %854 = vrcp.f32 %v590_v51  ;;  %v845_v54 = vpop.eup %844 }
 0x176   :  { %856 = vrcp.f32 %v600_v52  ;;  %v847_v55 = vpop.eup %846  ;;  %v611_v59 = vadd.f32 1.0, %v845_v54 }
 0x177   :  { %v849_v56 = vpop.eup %848 }
 0x178   :  { %v612_v2 = vadd.f32 1.0, %v849_v56  ;;  %858 = vrcp.f32 %v611_v59 }
 0x17d   :  { %v851_v58 = vpop.eup %850 }
 0x17e   :  { %v853_v60 = vpop.eup %852  ;;  %v617_v62 = vmul.f32 %v851_v58, %v843_v53 }
 0x17f   :  { %v855_v63 = vpop.eup %854  ;;  %v615_v0 = vmul.f32 %v853_v60, %v581_v57 }
 0x180   :  { %v857_v1 = vpop.eup %856  ;;  %v618_v3 = vmul.f32 %v855_v63, %v847_v55 }
 0x181   :  { %v616_v4 = vmul.f32 %v857_v1, %v582_v61  ;;  %v619_v5 = vadd.f32 %v617_v62, %v615_v0 }
 0x183   :  { %v620_v6 = vadd.f32 %v618_v3, %v616_v4  ;;  %860 = vtanh.f32 %v619_v5  ;;  %625 = vst [vmem:[#allocation11] sm:$0xff] %v619_v5 }
 0x184   :  { %862 = vrcp.f32 %v612_v2 }
 0x185   :  { %864 = vtanh.f32 %v620_v6  ;;  %626 = vst [vmem:[#allocation11 + $0x8] sm:$0xff] %v620_v6 }
 0x186   :  { %965 = shalt.err (!%p962_p8)
}
 0x187   :  { %s966_s29 = scalar_lea.hbm %s1162_s5, 256 }
 0x188   :  { %p967_p9 = scmp.ne.s32.totalorder %s1162_s5, %s966_s29  ;;  %p970_p10 = scmp.lt.u32.totalorder %s966_s29, %s1162_s5 }
 0x18a   :  { %p972_p11 = pnand %p970_p10, %p967_p9 }
 0x18c   :  { %975 = shalt.err (!%p972_p11)
}
 0x18d   :  { %640 = dma.vmem_to_hbm [thread:$0]  %s635_s25, 256, %s1162_s5, [#allocation5], %s1010_s9, %s1010_s9, %s1011_s10   ;;  %v859_v7 = vpop.eup %858 }
 0x18e   :  { %v861_v8 = vpop.eup %860  ;;  %s1017_s12 = smov [#allocation12]  }
 0x18f   :  { %s646_s13 = sshll.u32 %s1017_s12, 4  ;;  %v863_v9 = vpop.eup %862  ;;  %v623_v10 = vmul.f32 %v861_v8, %v859_v7  ;;  %s647_s13 = int_to_ptr.vmem [resolvable:$true] %s646_s13 }
 0x190   :  { %v865_v11 = vpop.eup %864  ;;  %s976_s14 = scalar_lea.vmem %s647_s13, 256  ;;  %p981_p13 = scmp.lt.s32.totalorder %s647_s13, %s647_s13 }
 0x191   :  { %v624_v12 = vmul.f32 %v865_v11, %v863_v9  ;;  %627 = vst [vmem:[#allocation12] sm:$0xff] %v623_v10  ;;  %p977_p12 = scmp.ne.s32.totalorder %s647_s13, %s976_s14  ;;  %p982_p0 = scmp.lt.s32.totalorder %s976_s14, %s976_s14 }
 0x193   :  { %628 = vst [vmem:[#allocation12 + $0x8] sm:$0xff] %v624_v12  ;;  %p983_p1 = por %p982_p0, %p981_p13 }
 0x195   :  { %p984_p2 = pnand %p983_p1, %p977_p12 }
 0x197   :  { %987 = shalt.err (!%p984_p2)
}
 0x198   :  { %s988_s16 = scalar_lea.hbm %s1163_s6, 256 }
 0x199   :  { %p989_p3 = scmp.ne.s32.totalorder %s1163_s6, %s988_s16  ;;  %p992_p4 = scmp.lt.u32.totalorder %s988_s16, %s1163_s6 }
 0x19b   :  { %p994_p5 = pnand %p992_p4, %p989_p3 }
 0x19d   :  { %997 = shalt.err (!%p994_p5)
}
 0x19e   :  { %652 = dma.vmem_to_hbm [thread:$0]  %s647_s13, 256, %s1163_s6, [#allocation13], %s1010_s9, %s1010_s9, %s1011_s10  }
 0x19f   :  { %1004 = dma.done.wait [#allocation5], 256  }
 0x1a0   :  { %1005 = vsyncadd [#allocation5], 4294967040 }
 0x1a1   :  { %1006 = dma.done.wait [#allocation13], 256  }
 0x1a2   :  { %1007 = vsyncadd [#allocation13], 4294967040 }
 0x1a3   :  { %659 = vsyncpa [#allocation4], 1 }
 0x1a4   :  { %660 = vsyncpa [#allocation7], 1 }
 0x1a5   :  { %661 = vsyncpa [#allocation10], 1 }
 0x1a6   :  { %662 = vsyncpa [#allocation5], 1 }
 0x1a7   :  { %663 = vsyncpa [#allocation13], 1 }

</bundles_post_ra>
